<compile_context>
chip_gen: v6e
topology: v6e:2x2x1
jax: 0.10.0
libtpu: 0.0.40
codegen_flags: <defaults>
</compile_context>

<pallas_src>
import jax
import jax.numpy as jnp
from jax.experimental import pallas as pl
from jax.experimental.pallas import tpu as pltpu

BN_EPS = 1e-5


def _make_kernel(num_layers):
    def kernel(*refs):
        x_ref = refs[0]                  # (C_in, TN) — batch dim squeezed out
        out_ref = refs[-1]               # (C_out, TN)
        params = refs[1:-1]              # (w_folded, bias) * num_layers
        h = x_ref[...]
        for k in range(num_layers):
            w = params[2 * k][...]       # (co, ci), compute dtype, BN scale folded in
            b = params[2 * k + 1][...]   # (co, 1), f32
            # MXU matmul with f32 accumulation; operands in w.dtype (bf16 fast path).
            h = jnp.dot(w, h.astype(w.dtype), preferred_element_type=jnp.float32)
            h = jnp.maximum(h + b, 0.0)  # fused bias + ReLU in f32
        out_ref[...] = h.astype(out_ref.dtype)

    return kernel


def _choose_tile_n(N, chain, io_bytes, vmem_budget_bytes, max_tile_n):
    """Largest lane-axis tile that fits the VMEM budget, minimizing padding."""
    c_in, c_out = chain[0], chain[-1]
    # Per-point VMEM working set: double-buffered input/output blocks plus a
    # generous allowance for the widest f32 intermediate and its bf16 copy.
    per_point = 2 * io_bytes * (c_in + c_out) + 6 * max(chain)
    cap = min(max_tile_n, max(128, (vmem_budget_bytes // per_point) // 128 * 128))
    n_pad = ((N + 127) // 128) * 128
    n_tiles = (n_pad + cap - 1) // cap
    tile_n = (((n_pad + n_tiles - 1) // n_tiles) + 127) // 128 * 128  # <= cap
    return tile_n, n_tiles


def dynamic_point_ponder_conv_upsampling(x_bcn, layer_params, *,
                                         compute_dtype=jnp.bfloat16,
                                         tile_n=None,
                                         vmem_budget_bytes=20 << 20,
                                         max_tile_n=65536):
    """x_bcn: (B, C_in, N), channel-major (PyTorch layout). Output dtype follows
    x_bcn.dtype (pass a bf16 x for bf16 I/O). layer_params: list of
    (w_folded (co, ci), bias (co, 1)) with eval-mode BN already folded."""
    B, C_in, N = x_bcn.shape
    num_layers = len(layer_params)
    chain = [C_in] + [w.shape[0] for (w, _) in layer_params]
    C_out = chain[-1]
    io_bytes = jnp.dtype(x_bcn.dtype).itemsize

    if tile_n is None:
        tile_n, n_tiles = _choose_tile_n(N, chain, io_bytes,
                                         vmem_budget_bytes, max_tile_n)
    else:
        assert tile_n % 128 == 0, "tile_n must be a multiple of 128"
        n_tiles = (N + tile_n - 1) // tile_n

    # Masked-tail replacement: pad the point axis, slice the result back.
    N_pad = tile_n * n_tiles
    if N_pad != N:
        x_bcn = jnp.pad(x_bcn, ((0, 0), (0, 0), (0, N_pad - N)))

    # TODO(synk): for production shapes with tiny per-batch N, fold the batch
    # dim into the block ((B, C, tile_n) blocks, grid over N only, einsum
    # in-kernel) so per-step DMA bytes stay large.

    # Input block: (1[squeezed], C_in, tile_n). Channel dim equals the full
    # array dim; lane dim is a multiple of 128 -> legal and lane-dense.
    in_specs = [pl.BlockSpec((None, C_in, tile_n), lambda b, n: (b, 0, n))]
    flat_params = []
    for (w, bias) in layer_params:
        co, ci = w.shape
        in_specs.append(pl.BlockSpec((co, ci), lambda b, n: (0, 0)))
        in_specs.append(pl.BlockSpec((co, 1), lambda b, n: (0, 0)))
        flat_params.extend([w.astype(compute_dtype), bias.astype(jnp.float32)])

    flops = 2 * B * N_pad * sum(a * b for a, b in zip(chain[:-1], chain[1:]))
    bytes_accessed = (io_bytes * B * N_pad * (C_in + C_out)
                      + sum(int(p.size) * p.dtype.itemsize for p in flat_params))

    out = pl.pallas_call(
        _make_kernel(num_layers),
        out_shape=jax.ShapeDtypeStruct((B, C_out, N_pad), x_bcn.dtype),
        grid=(B, n_tiles),
        in_specs=in_specs,
        out_specs=pl.BlockSpec((None, C_out, tile_n), lambda b, n: (b, 0, n)),
        compiler_params=pltpu.CompilerParams(
            dimension_semantics=("parallel", "parallel"),
            vmem_limit_bytes=32 * 1024 * 1024),
        cost_estimate=pl.CostEstimate(flops=flops, transcendentals=0,
                                      bytes_accessed=bytes_accessed),
    )(x_bcn, *flat_params)

    if N_pad != N:
        out = out[:, :, :N]
    return out  # (B, C_out, N), channel-major — no transposes needed


def init_params(key, mlps, input_feat_num, output_feat_num):
    """Mirror the PyTorch __init__: channel chain = [in] + flat(mlps) + [out].
    Eval-mode BatchNorm is folded: scale into the conv weight, the rest into a
    per-channel bias, so each layer is  y = relu(W_folded @ x + bias)."""
    chain = [input_feat_num] + [j for i in mlps for j in i] + [output_feat_num]
    params = []
    for k in range(len(chain) - 1):
        ci, co = chain[k], chain[k + 1]
        key, kw, kg, kb, km, kv = jax.random.split(key, 6)
        # Conv2d 1x1 weight (co, ci, 1, 1) -> (co, ci)
        w = (jax.random.normal(kw, (co, ci), jnp.float32)
             * (1.0 / jnp.sqrt(jnp.float32(ci))))
        gamma = 1.0 + 0.1 * jax.random.normal(kg, (co,), jnp.float32)
        beta = 0.1 * jax.random.normal(kb, (co,), jnp.float32)
        running_mean = 0.1 * jax.random.normal(km, (co,), jnp.float32)
        running_var = jnp.abs(jax.random.normal(kv, (co,), jnp.float32)) + 0.5
        scale = gamma / jnp.sqrt(running_var + BN_EPS)            # (co,)
        bias = beta - running_mean * scale                        # (co,)
        w_folded = w * scale[:, None]                             # (co, ci)
        params.append((w_folded, bias.reshape(co, 1)))
    return params


def reference(x_bcn, layer_params):
    """Pure-JAX f32 reference of the forward pass (eval-mode BN folded)."""
    h = x_bcn  # (B, C, N)
    for (w, b) in layer_params:
        h = jnp.einsum('oc,bcn->bon', w, h) + b[None, :, :]
        h = jnp.maximum(h, 0.0)
    return h


if __name__ == "__main__":
    key = jax.random.PRNGKey(0)
    kx, kp = jax.random.split(key)

    # Module config (synthetic, small): mlps=[[16],[32]] -> chain [4,16,32,8]
    mlps = [[16], [32]]
    input_feat_num = 4
    output_feat_num = 8

    B, N = 2, 1024  # tile_n auto-sizes to N=1024 -> grid (2, 1): one step per v7x TC
    x = jax.random.normal(kx, (B, input_feat_num, N), jnp.float32)
    layer_params = init_params(kp, mlps, input_feat_num, output_feat_num)

    ref = reference(x, layer_params)

    # Exact-semantics path (f32 MXU operands) -> tight check vs. pure-JAX ref.
    out_f32 = dynamic_point_ponder_conv_upsampling(
        x, layer_params, compute_dtype=jnp.float32)
    out_f32 = jax.block_until_ready(out_f32)
    assert out_f32.shape == (B, output_feat_num, N), out_f32.shape
    assert jnp.allclose(out_f32, ref, atol=1e-4, rtol=1e-4), "f32 mismatch vs reference"

    # Fast path (bf16 MXU operands, f32 accumulation) -> loose check.
    out_bf16 = dynamic_point_ponder_conv_upsampling(x, layer_params)
    out_bf16 = jax.block_until_ready(out_bf16)
    assert out_bf16.shape == (B, output_feat_num, N), out_bf16.shape
    assert jnp.allclose(out_bf16, ref, atol=8e-2, rtol=5e-2), "bf16 mismatch vs reference"

    print("KERNEL_OK")
</pallas_src>

<mosaic_0001>
module attributes {stable_mosaic.version = 11 : i64} {
  func.func @kernel(%arg0: i32, %arg1: i32, %arg2: memref<1x4x1024xf32, #tpu.memory_space<vmem>>, %arg3: memref<16x4xf32, #tpu.memory_space<vmem>>, %arg4: memref<16x1xf32, #tpu.memory_space<vmem>>, %arg5: memref<32x16xf32, #tpu.memory_space<vmem>>, %arg6: memref<32x1xf32, #tpu.memory_space<vmem>>, %arg7: memref<8x32xf32, #tpu.memory_space<vmem>>, %arg8: memref<8x1xf32, #tpu.memory_space<vmem>>, %arg9: memref<1x8x1024xf32, #tpu.memory_space<vmem>>) attributes {dimension_semantics = [#tpu.dimension_semantics<parallel>, #tpu.dimension_semantics<parallel>], iteration_bounds = array<i64: 2, 1>, scalar_prefetch = 0 : i64, scratch_operands = 0 : i64, tpu.core_type = #tpu.core_type<tc>, window_params = [{transform_indices = @transform_0, window_bounds = array<i64: 1, 4, 1024>}, {pipeline_mode = #tpu.pipeline_mode<synchronous>, transform_indices = @transform_1, window_bounds = array<i64: 16, 4>}, {pipeline_mode = #tpu.pipeline_mode<synchronous>, transform_indices = @transform_2, window_bounds = array<i64: 16, 1>}, {pipeline_mode = #tpu.pipeline_mode<synchronous>, transform_indices = @transform_3, window_bounds = array<i64: 32, 16>}, {pipeline_mode = #tpu.pipeline_mode<synchronous>, transform_indices = @transform_4, window_bounds = array<i64: 32, 1>}, {pipeline_mode = #tpu.pipeline_mode<synchronous>, transform_indices = @transform_5, window_bounds = array<i64: 8, 32>}, {pipeline_mode = #tpu.pipeline_mode<synchronous>, transform_indices = @transform_6, window_bounds = array<i64: 8, 1>}, {transform_indices = @transform_7, window_bounds = array<i64: 1, 8, 1024>}]} {
    %c0 = arith.constant 0 : index
    %c0_0 = arith.constant 0 : index
    %c0_1 = arith.constant 0 : index
    %0 = vector.load %arg2[%c0, %c0_0, %c0_1] : memref<1x4x1024xf32, #tpu.memory_space<vmem>>, vector<1x4x1024xf32>
    %1 = vector.shape_cast %0 : vector<1x4x1024xf32> to vector<4x1024xf32>
    %c0_2 = arith.constant 0 : index
    %c0_3 = arith.constant 0 : index
    %2 = vector.load %arg3[%c0_2, %c0_3] : memref<16x4xf32, #tpu.memory_space<vmem>>, vector<16x4xf32>
    %c0_4 = arith.constant 0 : index
    %c0_5 = arith.constant 0 : index
    %3 = vector.load %arg4[%c0_4, %c0_5] : memref<16x1xf32, #tpu.memory_space<vmem>>, vector<16x1xf32>
    %cst = arith.constant dense<0.000000e+00> : vector<16x1024xf32>
    %4 = tpu.matmul %2, %1, %cst {dimension_numbers = #tpu.dot_dimension_numbers<[1], [0], [0], [1], [0, 0, 1, 1], [], []>} : vector<16x4xf32>, vector<4x1024xf32>, vector<16x1024xf32> -> vector<16x1024xf32>
    %5 = vector.broadcast %3 : vector<16x1xf32> to vector<16x1024xf32>
    %6 = arith.addf %4, %5 : vector<16x1024xf32>
    %cst_6 = arith.constant 0.000000e+00 : f32
    %7 = vector.broadcast %cst_6 : f32 to vector<16x1024xf32>
    %8 = arith.maximumf %6, %7 : vector<16x1024xf32>
    %c0_7 = arith.constant 0 : index
    %c0_8 = arith.constant 0 : index
    %9 = vector.load %arg5[%c0_7, %c0_8] : memref<32x16xf32, #tpu.memory_space<vmem>>, vector<32x16xf32>
    %c0_9 = arith.constant 0 : index
    %c0_10 = arith.constant 0 : index
    %10 = vector.load %arg6[%c0_9, %c0_10] : memref<32x1xf32, #tpu.memory_space<vmem>>, vector<32x1xf32>
    %cst_11 = arith.constant dense<0.000000e+00> : vector<32x1024xf32>
    %11 = tpu.matmul %9, %8, %cst_11 {dimension_numbers = #tpu.dot_dimension_numbers<[1], [0], [0], [1], [0, 0, 1, 1], [], []>} : vector<32x16xf32>, vector<16x1024xf32>, vector<32x1024xf32> -> vector<32x1024xf32>
    %12 = vector.broadcast %10 : vector<32x1xf32> to vector<32x1024xf32>
    %13 = arith.addf %11, %12 : vector<32x1024xf32>
    %cst_12 = arith.constant 0.000000e+00 : f32
    %14 = vector.broadcast %cst_12 : f32 to vector<32x1024xf32>
    %15 = arith.maximumf %13, %14 : vector<32x1024xf32>
    %c0_13 = arith.constant 0 : index
    %c0_14 = arith.constant 0 : index
    %16 = vector.load %arg7[%c0_13, %c0_14] : memref<8x32xf32, #tpu.memory_space<vmem>>, vector<8x32xf32>
    %c0_15 = arith.constant 0 : index
    %c0_16 = arith.constant 0 : index
    %17 = vector.load %arg8[%c0_15, %c0_16] : memref<8x1xf32, #tpu.memory_space<vmem>>, vector<8x1xf32>
    %cst_17 = arith.constant dense<0.000000e+00> : vector<8x1024xf32>
    %18 = tpu.matmul %16, %15, %cst_17 {dimension_numbers = #tpu.dot_dimension_numbers<[1], [0], [0], [1], [0, 0, 1, 1], [], []>} : vector<8x32xf32>, vector<32x1024xf32>, vector<8x1024xf32> -> vector<8x1024xf32>
    %19 = vector.broadcast %17 : vector<8x1xf32> to vector<8x1024xf32>
    %20 = arith.addf %18, %19 : vector<8x1024xf32>
    %cst_18 = arith.constant 0.000000e+00 : f32
    %21 = vector.broadcast %cst_18 : f32 to vector<8x1024xf32>
    %22 = arith.maximumf %20, %21 : vector<8x1024xf32>
    %c0_19 = arith.constant 0 : index
    %c0_20 = arith.constant 0 : index
    %c0_21 = arith.constant 0 : index
    %23 = vector.load %arg9[%c0_19, %c0_20, %c0_21] : memref<1x8x1024xf32, #tpu.memory_space<vmem>>, vector<1x8x1024xf32>
    %24 = vector.shape_cast %23 : vector<1x8x1024xf32> to vector<8x1024xf32>
    %25 = vector.shape_cast %22 : vector<8x1024xf32> to vector<1x8x1024xf32>
    tpu.vector_store %arg9[%c0_19, %c0_20, %c0_21], %25 {strides = array<i32>} : memref<1x8x1024xf32, #tpu.memory_space<vmem>>, vector<1x8x1024xf32>,
    return
  }
  func.func @transform_0(%arg0: i32, %arg1: i32) -> (i32, i32, i32) {
    %c0_i32 = arith.constant 0 : i32
    %c0_i32_0 = arith.constant 0 : i32
    return %arg0, %c0_i32, %arg1 : i32, i32, i32
  }
  func.func @transform_1(%arg0: i32, %arg1: i32) -> (i32, i32) {
    %c0_i32 = arith.constant 0 : i32
    %c0_i32_0 = arith.constant 0 : i32
    %c0_i32_1 = arith.constant 0 : i32
    return %c0_i32, %c0_i32_0 : i32, i32
  }
  func.func @transform_2(%arg0: i32, %arg1: i32) -> (i32, i32) {
    %c0_i32 = arith.constant 0 : i32
    %c0_i32_0 = arith.constant 0 : i32
    %c0_i32_1 = arith.constant 0 : i32
    return %c0_i32, %c0_i32_0 : i32, i32
  }
  func.func @transform_3(%arg0: i32, %arg1: i32) -> (i32, i32) {
    %c0_i32 = arith.constant 0 : i32
    %c0_i32_0 = arith.constant 0 : i32
    %c0_i32_1 = arith.constant 0 : i32
    return %c0_i32, %c0_i32_0 : i32, i32
  }
  func.func @transform_4(%arg0: i32, %arg1: i32) -> (i32, i32) {
    %c0_i32 = arith.constant 0 : i32
    %c0_i32_0 = arith.constant 0 : i32
    %c0_i32_1 = arith.constant 0 : i32
    return %c0_i32, %c0_i32_0 : i32, i32
  }
  func.func @transform_5(%arg0: i32, %arg1: i32) -> (i32, i32) {
    %c0_i32 = arith.constant 0 : i32
    %c0_i32_0 = arith.constant 0 : i32
    %c0_i32_1 = arith.constant 0 : i32
    return %c0_i32, %c0_i32_0 : i32, i32
  }
  func.func @transform_6(%arg0: i32, %arg1: i32) -> (i32, i32) {
    %c0_i32 = arith.constant 0 : i32
    %c0_i32_0 = arith.constant 0 : i32
    %c0_i32_1 = arith.constant 0 : i32
    return %c0_i32, %c0_i32_0 : i32, i32
  }
  func.func @transform_7(%arg0: i32, %arg1: i32) -> (i32, i32, i32) {
    %c0_i32 = arith.constant 0 : i32
    %c0_i32_0 = arith.constant 0 : i32
    return %arg0, %c0_i32, %arg1 : i32, i32, i32
  }
}

</mosaic_0001>

<bundles_post_ra>
// kernel: tpu_custom_call.1
= control target key start
LH: loop header
LB: loop body
LE: loop exit
PB: predicated region body
PF: predicated region fallthrough
CT: control target
= control target key end

     0   :  { %12 = vsyncpa [#allocation3], 0  ;;  %s2023_s0 = inlined_call_operand.vmem [shape: f32[2,4,1024], index: 0, kind: input, shape index: {}]   ;;  %s2024_s1 = inlined_call_operand.vmem [shape: f32[16,4], index: 1, kind: input, shape index: {}]   ;;  %s2025_s2 = inlined_call_operand.vmem [shape: f32[16,1], index: 2, kind: input, shape index: {}]   ;;  %s2026_s3 = inlined_call_operand.vmem [shape: f32[32,16], index: 3, kind: input, shape index: {}]   ;;  %s2027_s4 = inlined_call_operand.vmem [shape: f32[32,1], index: 4, kind: input, shape index: {}]   ;;  %s2028_s5 = inlined_call_operand.vmem [shape: f32[8,32], index: 5, kind: input, shape index: {}]   ;;  %s2029_s6 = inlined_call_operand.vmem [shape: f32[8,1], index: 6, kind: input, shape index: {}]   ;;  %s2030_s7 = inlined_call_operand.hbm [shape: f32[2,8,1024], index: 7, kind: output, shape index: {}]  }
   0x1   :  { %14 = vsyncpa [#allocation3 + $0x1], 0  ;;  %s1750_s24 = smov 0   ;;  %s1752_s25 = smov 0  }
   0x2   :  { %s1754_s26 = smov 0   ;;  %s1756_s27 = smov 0  }
   0x3   :  { %s1758_s28 = smov 0   ;;  %s1760_s29 = smov 0  }
   0x4 LB: > { %s1515_s30 = sadd.s32 4294967295, %s1705_s29   ;;  %s1516_s8 = sadd.s32 4294967294, %s1705_s29   ;;  %s1705_s29 = sphi %s1760_s29, %s20_s29   ;;  %s1701_s28 = sphi %s1758_s28, %s2037_s28   ;;  %s1697_s27 = sphi %s1756_s27, %s2036_s27   ;;  %s1693_s26 = sphi %s1754_s26, %s2035_s26   ;;  %s1689_s25 = sphi %s1752_s25, %s2034_s25   ;;  %s1685_s24 = sphi %s1750_s24, %s2033_s24  }
   0x5   : > { %s32_s9 = sadd.s32 1, %s1701_s28  ;;  %s195_s10 = sadd.s32 1, %s1693_s26 }
   0x6   : > { %p34_p0 = scmp.ge.s32.totalorder %s32_s9, 2  ;;  %p205_p1 = scmp.ne.s32.totalorder %s1693_s26, %s1689_s25 }
   0x7   : > { %p206_p2 = scmp.eq.s32.totalorder %s1515_s30, 1  ;;  %p211_p3 = scmp.ne.s32.totalorder %s1689_s25, %s1685_s24 }
   0x8   : > { %s2039_s9 = smov (%p34_p0, %s32_s9), 0  ;;  %p212_p5 = scmp.eq.s32.totalorder %s1516_s8, 1 }
   0x9   : > { %p1790_p4 = por %p206_p2, %p205_p1  ;;  %s190_s12 = ssub.s32 %s1701_s28, %s2039_s9 }
   0xa   : > { %p1519_p6 = scmp.ge.s32.totalorder %s1705_s29, 1  ;;  %p193_p7 = scmp.eq.s32.totalorder %s190_s12, 0 }
   0xb   : > { %p1797_p8 = por %p212_p5, %p211_p3  ;;  %p261_p9 = scmp.lt.s32.totalorder %s1705_s29, 3 }
   0xc   : > { %s1803_s14 = scalar_select %p193_p7, %s1693_s26, %s195_s10  }
   0xd   : > { %p262_p10 = pnand %p1519_p6, %p261_p9 }
   0xe   : > { %p298_p11 = scmp.lt.s32.totalorder (!%p262_p10), %s1697_s27, 1  ;;  %s294_s22 = sand.u32 (!%p262_p10), 1, %s1689_s25  }
   0xf   : > { %265 = sbr.rel (%p262_p10) target bundleno = 685 (0x2ad), region = 48  ;;  %s1565_s8 = sshll.u32 (!%p262_p10), %s1697_s27, 10 }
  0x10   : > { %s1981_s16 = scalar_lea.hbm (!%p262_p10), %s2030_s7, %s1565_s8 }
  0x14   : > { %v1707_v0 = vmov 0.0   ;;  %v315_v1 = vld [vmem:[%s2025_s2 + $0x8] sm:$0xff]  ;;  %s299_s17 = scalar_select %p298_p11, %s1697_s27, 1  ;;  %v1708_v2 = vmov 0   ;;  %v314_v3 = vld [vmem:[%s2025_s2] sm:$0xff]  ;;  %vm341_vm0 = vcmask 1043456  }
  0x15   : > { %422 = vmatprep.mubr.f32.mxu0 %v1707_v0  ;;  %499 = vmatprep.mubr.f32.mxu1 %v1707_v0  ;;  %v312_v10 = vld [vmem:[%s2024_s1] sm:$0xff]  ;;  %vm334_vm1 = vcmask 31744   ;;  %v313_v13 = vld [vmem:[%s2024_s1 + $0x8] sm:$0xff]  ;;  %v689_v16 = vld [vmem:[%s2027_s4 + $0x18] sm:$0xff]  ;;  %vm710_vm2 = vcmask 130048   ;;  %vm1118_vm3 = vcmask 261120  }
  0x16   : > { %1623 = vset.pattern.permute.xlu0 %v1708_v2  ;;  %1624 = vset.pattern.permute.xlu1 %v1708_v2  ;;  %s1564_s18 = sshll.u32 %s299_s17, 5  ;;  %v687_v14 = vld [vmem:[%s2027_s4 + $0x8] sm:$0xff]  ;;  %v1112_v15 = vld [vmem:[%s2029_s6] sm:$0xff]  ;;  %v688_v17 = vld [vmem:[%s2027_s4 + $0x10] sm:$0xff]  ;;  %s1423_s27 = scalar_lea.sflag [#allocation3], %s294_s22 }
  0x17   : > { %323 = vperm.xlu0 %1623, %v315_v1   ;;  %s305_s23 = scalar_lea.vmem %s2023_s0, %s1564_s18  ;;  %707 = vperm.xlu1 %1624, %v689_v16   ;;  %v686_v18 = vld [vmem:[%s2027_s4] sm:$0xff]  ;;  %v683_v60 = vld [vmem:[%s2026_s3 + $0x8] sm:$0xff]  ;;  %s1709_s18 = smov [#allocation2]  }
  0x18   : > { %v308_v4 = vld [vmem:[%s305_s23] sm:$0xff]  ;;  %v309_v5 = vld [vmem:[%s305_s23 + $0x8] sm:$0xff]  ;;  %v310_v6 = vld [vmem:[%s305_s23 + $0x10] sm:$0xff]  ;;  %s1633_s19 = sshll.u32 %s1709_s18, 4  ;;  %s1634_s19 = int_to_ptr.vmem [resolvable:$false] %s1633_s19 }
  0x19   : > { %v330_v7 = vcombine.high %v308_v4, %v308_v4  ;;  %v331_v8 = vcombine.high %v309_v5, %v309_v5  ;;  %v311_v9 = vld [vmem:[%s305_s23 + $0x18] sm:$0xff]  ;;  %v332_v11 = vcombine.high %v310_v6, %v310_v6  ;;  %v682_v51 = vld [vmem:[%s2026_s3] sm:$0xff]  ;;  %s1520_s23 = sshll.u32 %s294_s22, 6  ;;  %s1635_s20 = scalar_lea.vmem %s1634_s19, 2048 }
  0x1a   : > { %v333_v12 = vcombine.high %v311_v9, %v311_v9  ;;  %s296_s30 = scalar_lea.vmem [#allocation2], %s1520_s23 }
  0x1b   : > { %318 = vperm.xlu0 %1623, %v314_v3   ;;  %1523 = vmatprep.subr.msk.mxu0 %vm341_vm0, %v330_v7  ;;  %s1439_s10 = sshll.u32 %s296_s30, 4  ;;  %s1440_s10 = int_to_ptr.vmem [resolvable:$true] %s1439_s10 }
  0x1c   : > { %1527 = vmatprep.subr.msk.mxu1 %vm341_vm0, %v331_v8  ;;  %1524 = vmatpush1.msk.msra.mxu0 %vm341_vm0, %v308_v4  ;;  %v684_v8 = vld [vmem:[%s2026_s3 + $0x10] sm:$0xff]  ;;  %s1629_s17 = scalar_lea.vmem %s1440_s10, 1024  ;;  %p1636_p1 = scmp.lt.s32.totalorder %s1440_s10, %s1634_s19 }
  0x1d   : > { %1528 = vmatpush1.msk.msra.mxu1 %vm341_vm0, %v309_v5  ;;  %1525 = vmatmul.mubr.msk.f32.vlgmr.msra.gmra.mxu0 %vm334_vm1, %v312_v10  ;;  %p1630_p12 = scmp.ne.s32.totalorder %s1440_s10, %s1629_s17  ;;  %p1637_p2 = scmp.lt.s32.totalorder %s1635_s20, %s1629_s17 }
  0x1e   : > { %1529 = vmatmul.mubr.msk.f32.vlgmr.msra.gmra.mxu1 %vm334_vm1, %v312_v10  ;;  %428 = vmatprep.mubr.f32.mxu0 %v1707_v0 }
  0x1f   : > { %505 = vmatprep.mubr.f32.mxu1 %v1707_v0  ;;  %1531 = vmatprep.subr.msk.mxu0 %vm341_vm0, %v332_v11  ;;  %p1631_p13 = pnand %p1630_p12, %p1790_p4  ;;  %p1638_p3 = por %p1637_p2, %p1636_p1 }
  0x20   : > { %1535 = vmatprep.subr.msk.mxu1 %vm341_vm0, %v333_v12  ;;  %1532 = vmatpush1.msk.msra.mxu0 %vm341_vm0, %v310_v6 }
  0x21   : > { %1536 = vmatpush1.msk.msra.mxu1 %vm341_vm0, %v311_v9  ;;  %1526 = vmatmul.mubr.msk.f32.gmra.mxu0 %vm334_vm1, %v313_v13  ;;  %v685_v9 = vld [vmem:[%s2026_s3 + $0x18] sm:$0xff]  ;;  %p1632_p0 = pneg %p1631_p13 }
  0x22   : > { %1530 = vmatmul.mubr.msk.f32.gmra.mxu1 %vm334_vm1, %v313_v13  ;;  %576 = vmatprep.mubr.f32.mxu0 %v1707_v0 }
  0x23   : > { %653 = vmatprep.mubr.f32.mxu1 %v1707_v0  ;;  %697 = vperm.xlu0 %1623, %v687_v14   ;;  %p1639_p5 = pnand %p1638_p3, %p1632_p0 }
  0x24   : > { %702 = vperm.xlu1 %1624, %v688_v17  }
  0x25   : > { %1533 = vmatmul.mubr.msk.f32.vlgmr.msra.gmra.mxu0 %vm334_vm1, %v312_v10 }
  0x26   : > { %1537 = vmatmul.mubr.msk.f32.vlgmr.msra.gmra.mxu1 %vm334_vm1, %v312_v10  ;;  %582 = vmatprep.mubr.f32.mxu0 %v1707_v0 }
  0x27   : > { %659 = vmatprep.mubr.f32.mxu1 %v1707_v0  ;;  %1115 = vperm.xlu0 %1623, %v1112_v15  }
  0x28   : > { %692 = vperm.xlu1 %1624, %v686_v18  }
  0x29   : > { %1534 = vmatmul.mubr.msk.f32.gmra.mxu0 %vm334_vm1, %v313_v13 }
  0x2a   : > { %1538 = vmatmul.mubr.msk.f32.gmra.mxu1 %vm334_vm1, %v313_v13  ;;  %787 = vmatprep.mubr.f32.mxu0 %v1707_v0 }
  0x2b   : > { %876 = vmatprep.mubr.f32.mxu1 %v1707_v0 }
  0x92   : > { %v324_v19 = vpop.permute.xlu0 %323  ;;  %v1907_v18 = vpop.permute.xlu1 %707 }
  0x96   : > { %v319_v26 = vpop.permute.xlu0 %318 }
  0xdd   : > { %v424_v20 = vpop.f32.mrf.mxu0 }
  0xde   : > { %v501_v21 = vpop.f32.mrf.mxu1  ;;  %v425_v35 = vadd.f32 %v424_v20, %v319_v26 }
  0xdf   : > { %v426_v22 = vpop.f32.mrf.mxu0  ;;  %v502_v36 = vadd.f32 %v501_v21, %v319_v26 }
  0xe0   : > { %v503_v23 = vpop.f32.mrf.mxu1  ;;  %v427_v31 = vadd.f32 %v426_v22, %v319_v26  ;;  %v666_v47 = vmax.f32 %v425_v35, 0.0 }
  0xe1   : > { %v430_v24 = vpop.f32.mrf.mxu0  ;;  %v504_v32 = vadd.f32 %v503_v23, %v319_v26  ;;  %v668_v48 = vmax.f32 %v502_v36, 0.0  ;;  %v1909_v23 = vpop.permute.xlu1 %702 }
  0xe2   : > { %v507_v25 = vpop.f32.mrf.mxu1  ;;  %v431_v27 = vadd.f32 %v430_v24, %v324_v19  ;;  %v667_v45 = vmax.f32 %v427_v31, 0.0 }
  0xe3   : > { %v508_v28 = vadd.f32 %v507_v25, %v324_v19  ;;  %v432_v29 = vpop.f32.mrf.mxu0  ;;  %v669_v46 = vmax.f32 %v504_v32, 0.0 }
  0xe4   : > { %v509_v30 = vpop.f32.mrf.mxu1  ;;  %v433_v33 = vadd.f32 %v432_v29, %v324_v19  ;;  %v674_v41 = vmax.f32 %v431_v27, 0.0 }
  0xe5   : > { %v510_v34 = vadd.f32 %v509_v30, %v324_v19  ;;  %v578_v37 = vpop.f32.mrf.mxu0  ;;  %v676_v42 = vmax.f32 %v508_v28, 0.0  ;;  %v1913_v30 = vpop.permute.xlu0 %697 }
  0xe6   : > { %v655_v38 = vpop.f32.mrf.mxu1  ;;  %v675_v39 = vmax.f32 %v433_v33, 0.0  ;;  %v579_v63 = vadd.f32 %v578_v37, %v319_v26 }
  0xe7   : > { %v677_v40 = vmax.f32 %v510_v34, 0.0  ;;  %v580_v43 = vpop.f32.mrf.mxu0  ;;  %v656_v1 = vadd.f32 %v655_v38, %v319_v26 }
  0xe8   : > { %v657_v44 = vpop.f32.mrf.mxu1  ;;  %751 = vmatprep.subr.mxu0 %v675_v39  ;;  %v581_v58 = vadd.f32 %v580_v43, %v319_v26  ;;  %v670_v6 = vmax.f32 %v579_v63, 0.0  ;;  %v1925_v39 = vpop.permute.xlu1 %692 }
  0xe9   : > { %840 = vmatprep.subr.mxu1 %v677_v40  ;;  %v584_v49 = vpop.f32.mrf.mxu0  ;;  %752 = vmatpush1.msra.mxu0 %v674_v41  ;;  %v658_v59 = vadd.f32 %v657_v44, %v319_v26  ;;  %v672_v7 = vmax.f32 %v656_v1, 0.0 }
  0xea   : > { %v661_v50 = vpop.f32.mrf.mxu1  ;;  %841 = vmatpush1.msra.mxu1 %v676_v42  ;;  %753 = vmatprep.subr.mxu0 %v667_v45  ;;  %v585_v52 = vadd.f32 %v584_v49, %v324_v19  ;;  %v671_v4 = vmax.f32 %v581_v58, 0.0 }
  0xeb   : > { %842 = vmatprep.subr.mxu1 %v669_v46  ;;  %v586_v53 = vpop.f32.mrf.mxu0  ;;  %754 = vmatpush1.msra.mxu0 %v666_v47  ;;  %v662_v55 = vadd.f32 %v661_v50, %v324_v19  ;;  %v673_v5 = vmax.f32 %v658_v59, 0.0 }
  0xec   : > { %v663_v54 = vpop.f32.mrf.mxu1  ;;  %843 = vmatpush1.msra.mxu1 %v668_v48  ;;  %v587_v56 = vadd.f32 %v586_v53, %v324_v19  ;;  %1539 = vmatmul.mubr.msk.f32.vlgmr.msra.gmra.mxu0 %vm710_vm2, %v682_v51  ;;  %v678_v2 = vmax.f32 %v585_v52, 0.0 }
  0xed   : > { %v664_v57 = vadd.f32 %v663_v54, %v324_v19  ;;  %1543 = vmatmul.mubr.msk.f32.vlgmr.msra.gmra.mxu1 %vm710_vm2, %v682_v51  ;;  %793 = vmatprep.mubr.f32.mxu0 %v1707_v0  ;;  %v680_v3 = vmax.f32 %v662_v55, 0.0 }
  0xee   : > { %882 = vmatprep.mubr.f32.mxu1 %v1707_v0  ;;  %v679_v61 = vmax.f32 %v587_v56, 0.0 }
  0xef   : > { %v681_v62 = vmax.f32 %v664_v57, 0.0 }
  0xf0   : > { %1540 = vmatmul.mubr.msk.f32.gmra.mxu0 %vm710_vm2, %v683_v60  ;;  %929 = vmatprep.subr.mxu0 %v679_v61 }
  0xf1   : > { %1544 = vmatmul.mubr.msk.f32.gmra.mxu1 %vm710_vm2, %v683_v60  ;;  %1018 = vmatprep.subr.mxu1 %v681_v62 }
  0xf2   : > { %930 = vmatpush1.msra.mxu0 %v678_v2  ;;  %1019 = vmatpush1.msra.mxu1 %v680_v3 }
  0xf3   : > { %931 = vmatprep.subr.mxu0 %v671_v4  ;;  %1020 = vmatprep.subr.mxu1 %v673_v5 }
  0xf4   : > { %799 = vmatprep.mubr.f32.mxu0 %v1707_v0  ;;  %888 = vmatprep.mubr.f32.mxu1 %v1707_v0 }
  0xf5   : > { %932 = vmatpush1.msra.mxu0 %v670_v6  ;;  %1021 = vmatpush1.msra.mxu1 %v672_v7 }
  0xf6   : > { %1541 = vmatmul.mubr.msk.f32.gmra.mxu0 %vm710_vm2, %v684_v8  ;;  %1545 = vmatmul.mubr.msk.f32.gmra.mxu1 %vm710_vm2, %v684_v8 }
  0xf7   : > { %805 = vmatprep.mubr.f32.mxu0 %v1707_v0  ;;  %894 = vmatprep.mubr.f32.mxu1 %v1707_v0 }
  0xfa   : > { %1542 = vmatmul.mubr.msk.f32.gmra.mxu0 %vm710_vm2, %v685_v9  ;;  %1546 = vmatmul.mubr.msk.f32.gmra.mxu1 %vm710_vm2, %v685_v9 }
  0xfb   : > { %965 = vmatprep.mubr.f32.mxu0 %v1707_v0  ;;  %1054 = vmatprep.mubr.f32.mxu1 %v1707_v0 }
  0xfe   : > { %1547 = vmatmul.mubr.msk.f32.vlgmr.msra.gmra.mxu0 %vm710_vm2, %v682_v51  ;;  %1551 = vmatmul.mubr.msk.f32.vlgmr.msra.gmra.mxu1 %vm710_vm2, %v682_v51 }
  0xff   : > { %971 = vmatprep.mubr.f32.mxu0 %v1707_v0  ;;  %1060 = vmatprep.mubr.f32.mxu1 %v1707_v0 }
 0x102   : > { %1548 = vmatmul.mubr.msk.f32.gmra.mxu0 %vm710_vm2, %v683_v60  ;;  %1552 = vmatmul.mubr.msk.f32.gmra.mxu1 %vm710_vm2, %v683_v60 }
 0x103   : > { %977 = vmatprep.mubr.f32.mxu0 %v1707_v0  ;;  %1066 = vmatprep.mubr.f32.mxu1 %v1707_v0 }
 0x106   : > { %1549 = vmatmul.mubr.msk.f32.gmra.mxu0 %vm710_vm2, %v684_v8  ;;  %1553 = vmatmul.mubr.msk.f32.gmra.mxu1 %vm710_vm2, %v684_v8 }
 0x107   : > { %983 = vmatprep.mubr.f32.mxu0 %v1707_v0  ;;  %1072 = vmatprep.mubr.f32.mxu1 %v1707_v0 }
 0x10a   : > { %1550 = vmatmul.mubr.msk.f32.gmra.mxu0 %vm710_vm2, %v685_v9  ;;  %1554 = vmatmul.mubr.msk.f32.gmra.mxu1 %vm710_vm2, %v685_v9  ;;  %v1942_v9 = vld [vmem:[%s2028_s5] sm:$0xff] }
 0x10b   : > { %1186 = vmatprep.mubr.f32.mxu0 %v1707_v0  ;;  %1257 = vmatprep.mubr.f32.mxu1 %v1707_v0 }
 0x1ac   : > { %v789_v10 = vpop.f32.mrf.mxu0 }
 0x1ad   : > { %v878_v11 = vpop.f32.mrf.mxu1  ;;  %v790_v58 = vadd.f32 %v789_v10, %v1925_v39 }
 0x1ae   : > { %v791_v12 = vpop.f32.mrf.mxu0  ;;  %v879_v59 = vadd.f32 %v878_v11, %v1925_v39 }
 0x1af   : > { %v880_v13 = vpop.f32.mrf.mxu1  ;;  %v792_v52 = vadd.f32 %v791_v12, %v1925_v39  ;;  %v1079_v7 = vmax.f32 %v790_v58, 0.0 }
 0x1b0   : > { %v795_v14 = vpop.f32.mrf.mxu0  ;;  %v881_v53 = vadd.f32 %v880_v13, %v1925_v39  ;;  %v1081_v8 = vmax.f32 %v879_v59, 0.0 }
 0x1b1   : > { %v884_v15 = vpop.f32.mrf.mxu1  ;;  %v796_v44 = vadd.f32 %v795_v14, %v1913_v30  ;;  %v1080_v3 = vmax.f32 %v792_v52, 0.0 }
 0x1b2   : > { %v797_v16 = vpop.f32.mrf.mxu0  ;;  %v885_v45 = vadd.f32 %v884_v15, %v1913_v30  ;;  %v1082_v4 = vmax.f32 %v881_v53, 0.0 }
 0x1b3   : > { %v886_v17 = vpop.f32.mrf.mxu1  ;;  %v798_v40 = vadd.f32 %v797_v16, %v1913_v30  ;;  %v1087_v62 = vmax.f32 %v796_v44, 0.0 }
 0x1b4   : > { %v887_v41 = vadd.f32 %v886_v17, %v1913_v30  ;;  %v1089_v63 = vmax.f32 %v885_v45, 0.0 }
 0x1b5   : > { %v1088_v60 = vmax.f32 %v798_v40, 0.0 }
 0x1b6   : > { %v801_v19 = vpop.f32.mrf.mxu0  ;;  %v890_v20 = vpop.f32.mrf.mxu1  ;;  %v1090_v61 = vmax.f32 %v887_v41, 0.0 }
 0x1b7   : > { %v802_v35 = vadd.f32 %v801_v19, %v1909_v23  ;;  %v891_v36 = vadd.f32 %v890_v20, %v1909_v23 }
 0x1b8   : > { %v803_v21 = vpop.f32.mrf.mxu0  ;;  %v892_v22 = vpop.f32.mrf.mxu1 }
 0x1b9   : > { %v804_v31 = vadd.f32 %v803_v21, %v1909_v23  ;;  %v893_v32 = vadd.f32 %v892_v22, %v1909_v23  ;;  %v1095_v54 = vmax.f32 %v802_v35, 0.0  ;;  %v1097_v55 = vmax.f32 %v891_v36, 0.0 }
 0x1ba   : > { %v807_v24 = vpop.f32.mrf.mxu0  ;;  %v896_v25 = vpop.f32.mrf.mxu1 }
 0x1bb   : > { %v808_v26 = vadd.f32 %v807_v24, %v1907_v18  ;;  %v897_v27 = vadd.f32 %v896_v25, %v1907_v18  ;;  %v1096_v50 = vmax.f32 %v804_v31, 0.0  ;;  %v1098_v51 = vmax.f32 %v893_v32, 0.0 }
 0x1bc   : > { %v809_v28 = vpop.f32.mrf.mxu0  ;;  %v898_v29 = vpop.f32.mrf.mxu1 }
 0x1bd   : > { %v810_v33 = vadd.f32 %v809_v28, %v1907_v18  ;;  %v899_v34 = vadd.f32 %v898_v29, %v1907_v18  ;;  %v1103_v46 = vmax.f32 %v808_v26, 0.0  ;;  %v1105_v47 = vmax.f32 %v897_v27, 0.0 }
 0x1be   : > { %v1921_v37 = vpop.f32.mrf.mxu0  ;;  %v1923_v38 = vpop.f32.mrf.mxu1 }
 0x1bf   : > { %v1104_v42 = vmax.f32 %v810_v33, 0.0  ;;  %v1106_v43 = vmax.f32 %v899_v34, 0.0  ;;  %v968_v36 = vadd.f32 %v1921_v37, %v1925_v39  ;;  %v1057_v40 = vadd.f32 %v1923_v38, %v1925_v39 }
 0x1c0   : > { %v1931_v48 = vpop.f32.mrf.mxu0  ;;  %v1933_v49 = vpop.f32.mrf.mxu1 }
 0x1c1   : > { %1146 = vmatprep.subr.mxu0 %v1104_v42  ;;  %1217 = vmatprep.subr.mxu1 %v1106_v43  ;;  %v970_v34 = vadd.f32 %v1931_v48, %v1925_v39  ;;  %v1083_v37 = vmax.f32 %v968_v36, 0.0  ;;  %v1085_v38 = vmax.f32 %v1057_v40, 0.0 }
 0x1c2   : > { %v973_v56 = vpop.f32.mrf.mxu0  ;;  %v1062_v57 = vpop.f32.mrf.mxu1  ;;  %1147 = vmatpush1.msra.mxu0 %v1103_v46  ;;  %1218 = vmatpush1.msra.mxu1 %v1105_v47 }
 0x1c3   : > { %1148 = vmatprep.subr.mxu0 %v1096_v50  ;;  %1219 = vmatprep.subr.mxu1 %v1098_v51  ;;  %v974_v29 = vadd.f32 %v973_v56, %v1913_v30  ;;  %v1063_v31 = vadd.f32 %v1062_v57, %v1913_v30  ;;  %v1084_v46 = vmax.f32 %v970_v34, 0.0 }
 0x1c4   : > { %v975_v1 = vpop.f32.mrf.mxu0  ;;  %v1064_v2 = vpop.f32.mrf.mxu1  ;;  %1149 = vmatpush1.msra.mxu0 %v1095_v54  ;;  %1220 = vmatpush1.msra.mxu1 %v1097_v55 }
 0x1c5   : > { %1150 = vmatprep.subr.mxu0 %v1088_v60  ;;  %1221 = vmatprep.subr.mxu1 %v1090_v61  ;;  %v1065_v26 = vadd.f32 %v1064_v2, %v1913_v30  ;;  %v1091_v44 = vmax.f32 %v974_v29, 0.0  ;;  %v1093_v45 = vmax.f32 %v1063_v31, 0.0 }
 0x1c6   : > { %v979_v5 = vpop.f32.mrf.mxu0  ;;  %v1068_v6 = vpop.f32.mrf.mxu1  ;;  %1151 = vmatpush1.msra.mxu0 %v1087_v62  ;;  %1222 = vmatpush1.msra.mxu1 %v1089_v63 }
 0x1c7   : > { %1152 = vmatprep.subr.mxu0 %v1080_v3  ;;  %1223 = vmatprep.subr.mxu1 %v1082_v4  ;;  %v980_v24 = vadd.f32 %v979_v5, %v1909_v23  ;;  %v1069_v25 = vadd.f32 %v1068_v6, %v1909_v23  ;;  %v1094_v43 = vmax.f32 %v1065_v26, 0.0 }
 0x1c8   : > { %v981_v10 = vpop.f32.mrf.mxu0  ;;  %v1070_v11 = vpop.f32.mrf.mxu1  ;;  %1153 = vmatpush1.msra.mxu0 %v1079_v7  ;;  %1224 = vmatpush1.msra.mxu1 %v1081_v8 }
 0x1c9   : > { %1555 = vmatmul.mubr.msk.f32.vlgmr.msra.gmra.mxu0 %vm1118_vm3, %v1942_v9  ;;  %1556 = vmatmul.mubr.msk.f32.vlgmr.msra.gmra.mxu1 %vm1118_vm3, %v1942_v9  ;;  %v982_v19 = vadd.f32 %v981_v10, %v1909_v23  ;;  %v1071_v20 = vadd.f32 %v1070_v11, %v1909_v23  ;;  %v1099_v41 = vmax.f32 %v980_v24, 0.0 }
 0x1ca   : > { %v985_v12 = vpop.f32.mrf.mxu0  ;;  %v1074_v13 = vpop.f32.mrf.mxu1  ;;  %1328 = vmatprep.mubr.f32.mxu0 %v1707_v0  ;;  %1399 = vmatprep.mubr.f32.mxu1 %v1707_v0  ;;  %v976_v0 = vadd.f32 %v975_v1, %v1913_v30  ;;  %v1101_v30 = vmax.f32 %v1069_v25, 0.0 }
 0x1cb   : > { %v986_v14 = vadd.f32 %v985_v12, %v1907_v18  ;;  %v1075_v15 = vadd.f32 %v1074_v13, %v1907_v18  ;;  %v1100_v35 = vmax.f32 %v982_v19, 0.0  ;;  %v1102_v23 = vmax.f32 %v1071_v20, 0.0 }
 0x1cc   : > { %v987_v16 = vpop.f32.mrf.mxu0  ;;  %v1076_v17 = vpop.f32.mrf.mxu1  ;;  %v1092_v42 = vmax.f32 %v976_v0, 0.0 }
 0x1cd   : > { %v988_v21 = vadd.f32 %v987_v16, %v1907_v18  ;;  %v1077_v22 = vadd.f32 %v1076_v17, %v1907_v18  ;;  %v1107_v32 = vmax.f32 %v986_v14, 0.0  ;;  %v1109_v33 = vmax.f32 %v1075_v15, 0.0 }
 0x1ce   : > { %v1059_v18 = vadd.f32 %v1933_v49, %v1925_v39  ;;  %v1116_v39 = vpop.permute.xlu0 %1115 }
 0x1cf   : > { %v1108_v27 = vmax.f32 %v988_v21, 0.0  ;;  %v1110_v28 = vmax.f32 %v1077_v22, 0.0 }
 0x1d0   : > { %v1086_v47 = vmax.f32 %v1059_v18, 0.0 }
 0x1d1   : > { %1288 = vmatprep.subr.mxu0 %v1108_v27  ;;  %1359 = vmatprep.subr.mxu1 %v1110_v28 }
 0x1d2   : > { %1289 = vmatpush1.msra.mxu0 %v1107_v32  ;;  %1360 = vmatpush1.msra.mxu1 %v1109_v33 }
 0x1d3   : > { %1290 = vmatprep.subr.mxu0 %v1100_v35  ;;  %1361 = vmatprep.subr.mxu1 %v1102_v23 }
 0x1d4   : > { %1291 = vmatpush1.msra.mxu0 %v1099_v41  ;;  %1362 = vmatpush1.msra.mxu1 %v1101_v30 }
 0x1d5   : > { %1292 = vmatprep.subr.mxu0 %v1092_v42  ;;  %1363 = vmatprep.subr.mxu1 %v1094_v43 }
 0x1d6   : > { %1293 = vmatpush1.msra.mxu0 %v1091_v44  ;;  %1364 = vmatpush1.msra.mxu1 %v1093_v45 }
 0x1d7   : > { %1294 = vmatprep.subr.mxu0 %v1084_v46  ;;  %1365 = vmatprep.subr.mxu1 %v1086_v47 }
 0x1d8   : > { %1295 = vmatpush1.msra.mxu0 %v1083_v37  ;;  %1366 = vmatpush1.msra.mxu1 %v1085_v38 }
 0x1d9   : > { %1557 = vmatmul.mubr.msk.f32.vlgmr.msra.gmra.mxu0 %vm1118_vm3, %v1942_v9  ;;  %1558 = vmatmul.mubr.msk.f32.vlgmr.msra.gmra.mxu1 %vm1118_vm3, %v1942_v9 }
 0x289   : > { %v1188_v48 = vpop.f32.mrf.mxu0  ;;  %v1259_v49 = vpop.f32.mrf.mxu1 }
 0x28a   : > { %v1189_v50 = vadd.f32 %v1188_v48, %v1116_v39  ;;  %v1260_v51 = vadd.f32 %v1259_v49, %v1116_v39 }
 0x28b   : > { %v1190_v52 = vpop.f32.mrf.mxu0  ;;  %v1261_v53 = vpop.f32.mrf.mxu1 }
 0x28c   : > { %v1406_v54 = vmax.f32 %v1189_v50, 0.0  ;;  %v1408_v55 = vmax.f32 %v1260_v51, 0.0  ;;  %v1191_v56 = vadd.f32 %v1190_v52, %v1116_v39  ;;  %v1262_v57 = vadd.f32 %v1261_v53, %v1116_v39 }
 0x28e   : > { %1414 = vst [vmem:[%s296_s30] sm:$0xff] %v1406_v54  ;;  %1416 = vst [vmem:[%s296_s30 + $0x10] sm:$0xff] %v1408_v55  ;;  %v1407_v58 = vmax.f32 %v1191_v56, 0.0  ;;  %v1409_v59 = vmax.f32 %v1262_v57, 0.0 }
 0x290   : > { %1415 = vst [vmem:[%s296_s30 + $0x8] sm:$0xff] %v1407_v58  ;;  %1417 = vst [vmem:[%s296_s30 + $0x18] sm:$0xff] %v1409_v59 }
 0x299   : > { %v1330_v60 = vpop.f32.mrf.mxu0  ;;  %v1401_v61 = vpop.f32.mrf.mxu1 }
 0x29a   : > { %v1331_v62 = vadd.f32 %v1330_v60, %v1116_v39  ;;  %v1402_v63 = vadd.f32 %v1401_v61, %v1116_v39 }
 0x29b   : > { %v1332_v1 = vpop.f32.mrf.mxu0  ;;  %v1403_v2 = vpop.f32.mrf.mxu1 }
 0x29c   : > { %v1410_v3 = vmax.f32 %v1331_v62, 0.0  ;;  %v1412_v4 = vmax.f32 %v1402_v63, 0.0  ;;  %v1333_v5 = vadd.f32 %v1332_v1, %v1116_v39  ;;  %v1404_v6 = vadd.f32 %v1403_v2, %v1116_v39 }
 0x29e   : > { %1418 = vst [vmem:[%s296_s30 + $0x20] sm:$0xff] %v1410_v3  ;;  %1420 = vst [vmem:[%s296_s30 + $0x30] sm:$0xff] %v1412_v4  ;;  %v1411_v7 = vmax.f32 %v1333_v5, 0.0  ;;  %v1413_v8 = vmax.f32 %v1404_v6, 0.0 }
 0x2a0   : > { %1419 = vst [vmem:[%s296_s30 + $0x28] sm:$0xff] %v1411_v7  ;;  %1421 = vst [vmem:[%s296_s30 + $0x38] sm:$0xff] %v1413_v8 }
 0x2a1   : > { %1642 = shalt.err (!%p1639_p5)
}
 0x2a2   : > { %s1643_s21 = scalar_lea.hbm %s1981_s16, 1024  ;;  %s1647_s30 = scalar_lea.hbm %s2030_s7, 2048 }
 0x2a3   : > { %p1644_p6 = scmp.ne.s32.totalorder %s1981_s16, %s1643_s21  ;;  %p1648_p10 = scmp.lt.s32.totalorder %s1981_s16, %s2030_s7 }
 0x2a4   : > { %p1649_p11 = scmp.lt.s32.totalorder %s1647_s30, %s1643_s21 }
 0x2a5   : > { %p1645_p7 = pnand %p1644_p6, %p1790_p4 }
 0x2a6   : > { %p1650_p12 = por %p1649_p11, %p1648_p10 }
 0x2a7   : > { %p1646_p9 = pneg %p1645_p7 }
 0x2a9   : > { %p1651_p13 = pnand %p1650_p12, %p1646_p9 }
 0x2ab   : > { %1654 = shalt.err (!%p1651_p13)
}
 0x2ac   : > { %1566 = dma.vmem_to_hbm [thread:$0]  (%p1790_p4), %s1440_s10, 1024, %s1981_s16, %s1423_s27  }
 0x2ad PF: > { %p1572_p0 = scmp.ge.s32.totalorder %s1705_s29, 2  ;;  %s1451_s15 = sand.u32 1, %s1685_s24  }
 0x2ae   : > { %s1452_s17 = scalar_lea.sflag [#allocation3], %s1451_s15 }
 0x2af   : > { %p1569_p1 = pnand %p1572_p0, %p1797_p8 }
 0x2b1   : > { %p1570_p2 = pneg %p1569_p1 }
 0x2b3   : > { %1680 = dma.done.wait (%p1570_p2), %s1452_s17, 1024  }
 0x2b4   : > { %1682 = vsyncadd (%p1570_p2), %s1452_s17, 4294966272  ;;  %s20_s29 = sadd.s32 1, %s1705_s29   ;;  %s2033_s24 = smov %s1689_s25 }
 0x2b5   : > { %p17_p3 = scmp.ge.s32.totalorder %s20_s29, 4   ;;  %s2034_s25 = smov %s1693_s26 }
 0x2b6   : > { %s2035_s26 = smov %s1803_s14  ;;  %s2036_s27 = smov %s1701_s28 }
 0x2b7   : > { %s2037_s28 = smov %s2039_s9  ;;  %19 = sbr.rel (!%p17_p3) target bundleno = 4 (0x4), region = 83 }
 0x2bc   :  { %1457 = vsyncpa [#allocation3], 1 }
 0x2bd   :  { %1459 = vsyncpa [#allocation3 + $0x1], 1 }

</bundles_post_ra>
